<compile_context>
chip_gen: v5e
topology: v5e:2x2
jax: 0.10.0
libtpu: 0.0.40
codegen_flags: <defaults>
</compile_context>

<pallas_src>
import functools

import jax
import jax.numpy as jnp
from jax.experimental import pallas as pl
from jax.experimental.pallas import tpu as pltpu


# ---- channel indices of the stacked (8, R_pad, 128) per-cell slab ----------
_DX, _DY, _DW, _DH = 0, 1, 2, 3
_PCONF, _OBJM, _CLSM, _IOU = 4, 5, 6, 7
_N_MAPS = 8

# ---- accumulator slots (SMEM scratch) ---------------------------------------
_A_NOBJ, _A_NNOOBJ = 0, 1
_A_SX, _A_SY, _A_SW, _A_SH = 2, 3, 4, 5
_A_BCE_OBJ, _A_BCE_NOOBJ = 6, 7
_A_CLSM_OBJ = 8
_A_PCONF_OBJ, _A_PCONF_NOOBJ = 9, 10
_A_CONF50, _A_DET, _A_IOU50DET, _A_IOU75DET = 11, 12, 13, 14
_N_ACC = 16


def _clamped_log(x):
    # torch.nn.BCELoss clamps log terms at -100
    return jnp.maximum(jnp.log(x), -100.0)


# -----------------------------------------------------------------------------
# Pallas kernel: masked reductions over the flattened grid + scalar epilogue
# -----------------------------------------------------------------------------
def _yolo_loss_kernel(stk_ref, cls_sum_ref, out_ref, acc_ref, *, n_cls):
    pid = pl.program_id(0)
    last = pl.num_programs(0) - 1

    @pl.when(pid == 0)
    def _init():
        for i in range(_N_ACC):
            acc_ref[i] = jnp.float32(0.0)

    objm = stk_ref[_OBJM]                       # +1 obj, -1 noobj, 0 neither
    obj = jnp.maximum(objm, 0.0)
    noobj = jnp.maximum(-objm, 0.0)
    pconf = stk_ref[_PCONF]
    clsm = stk_ref[_CLSM]
    iou = stk_ref[_IOU]

    dx = stk_ref[_DX]
    dy = stk_ref[_DY]
    dw = stk_ref[_DW]
    dh = stk_ref[_DH]

    # obj and noobj are disjoint; tconf == obj_mask (1 at obj cells, else 0).
    #   BCE at obj cells:   -log(pconf)
    #   BCE at noobj cells: -log(1 - pconf)
    log_p = _clamped_log(pconf)
    log_1mp = _clamped_log(1.0 - pconf)

    conf50 = (pconf > 0.5).astype(jnp.float32)
    iou50 = (iou > 0.5).astype(jnp.float32)
    iou75 = (iou > 0.75).astype(jnp.float32)
    detected = conf50 * clsm * obj

    # Padded cells carry objm = pconf = iou = clsm = 0, so every reduction
    # below (masked or not) is unaffected by the padding.
    acc_ref[_A_NOBJ] += jnp.sum(obj)
    acc_ref[_A_NNOOBJ] += jnp.sum(noobj)
    acc_ref[_A_SX] += jnp.sum(obj * dx * dx)
    acc_ref[_A_SY] += jnp.sum(obj * dy * dy)
    acc_ref[_A_SW] += jnp.sum(obj * dw * dw)
    acc_ref[_A_SH] += jnp.sum(obj * dh * dh)
    acc_ref[_A_BCE_OBJ] += jnp.sum(obj * (-log_p))
    acc_ref[_A_BCE_NOOBJ] += jnp.sum(noobj * (-log_1mp))
    acc_ref[_A_CLSM_OBJ] += jnp.sum(obj * clsm)
    acc_ref[_A_PCONF_OBJ] += jnp.sum(obj * pconf)
    acc_ref[_A_PCONF_NOOBJ] += jnp.sum(noobj * pconf)
    acc_ref[_A_CONF50] += jnp.sum(conf50)
    acc_ref[_A_DET] += jnp.sum(detected)
    acc_ref[_A_IOU50DET] += jnp.sum(iou50 * detected)
    acc_ref[_A_IOU75DET] += jnp.sum(iou75 * detected)

    @pl.when(pid == last)
    def _finalize():
        n_obj = acc_ref[_A_NOBJ]
        n_noobj = acc_ref[_A_NNOOBJ]
        # Compute the reciprocals once and multiply (instead of many divides).
        inv_obj = 1.0 / n_obj
        inv_noobj = 1.0 / n_noobj

        loss_x = acc_ref[_A_SX] * inv_obj
        loss_y = acc_ref[_A_SY] * inv_obj
        loss_w = acc_ref[_A_SW] * inv_obj
        loss_h = acc_ref[_A_SH] * inv_obj
        # obj_scale = 1, noobj_scale = 100
        loss_conf = (acc_ref[_A_BCE_OBJ] * inv_obj
                     + 100.0 * acc_ref[_A_BCE_NOOBJ] * inv_noobj)
        loss_cls = cls_sum_ref[0] * inv_obj * (1.0 / float(n_cls))
        total = loss_x + loss_y + loss_w + loss_h + loss_conf + loss_cls

        cls_acc = 100.0 * acc_ref[_A_CLSM_OBJ] * inv_obj
        conf_obj = acc_ref[_A_PCONF_OBJ] * inv_obj
        conf_noobj = acc_ref[_A_PCONF_NOOBJ] * inv_noobj
        inv_c50 = 1.0 / (acc_ref[_A_CONF50] + 1e-16)
        inv_det = 1.0 / (acc_ref[_A_DET] + 1e-16)
        precision = acc_ref[_A_IOU50DET] * inv_c50
        recall50 = acc_ref[_A_IOU50DET] * inv_det
        recall75 = acc_ref[_A_IOU75DET] * inv_det

        out_ref[0] = total
        out_ref[1] = loss_x
        out_ref[2] = loss_y
        out_ref[3] = loss_w
        out_ref[4] = loss_h
        out_ref[5] = loss_conf
        out_ref[6] = loss_cls
        out_ref[7] = cls_acc
        out_ref[8] = recall50
        out_ref[9] = recall75
        out_ref[10] = precision
        out_ref[11] = conf_obj
        out_ref[12] = conf_noobj
        out_ref[13] = jnp.float32(0.0)
        out_ref[14] = jnp.float32(0.0)
        out_ref[15] = jnp.float32(0.0)


# -----------------------------------------------------------------------------
# build_targets (plain JAX glue: scatters/gathers over a small list of GT boxes)
# -----------------------------------------------------------------------------
def _bbox_wh_iou(anchors, gwh):
    # anchors: (nA, 2), gwh: (nT, 2) -> (nA, nT)
    aw = anchors[:, 0][:, None]
    ah = anchors[:, 1][:, None]
    gw = gwh[:, 0][None, :]
    gh = gwh[:, 1][None, :]
    inter = jnp.minimum(aw, gw) * jnp.minimum(ah, gh)
    union = aw * ah + 1e-16 + gw * gh - inter
    return inter / union


def _bbox_iou_xywh(box1, box2):
    # center-xywh boxes, same +1 convention as the reference implementation
    b1_x1, b1_x2 = box1[:, 0] - box1[:, 2] / 2, box1[:, 0] + box1[:, 2] / 2
    b1_y1, b1_y2 = box1[:, 1] - box1[:, 3] / 2, box1[:, 1] + box1[:, 3] / 2
    b2_x1, b2_x2 = box2[:, 0] - box2[:, 2] / 2, box2[:, 0] + box2[:, 2] / 2
    b2_y1, b2_y2 = box2[:, 1] - box2[:, 3] / 2, box2[:, 1] + box2[:, 3] / 2
    ix1 = jnp.maximum(b1_x1, b2_x1)
    iy1 = jnp.maximum(b1_y1, b2_y1)
    ix2 = jnp.minimum(b1_x2, b2_x2)
    iy2 = jnp.minimum(b1_y2, b2_y2)
    inter = jnp.maximum(ix2 - ix1 + 1.0, 0.0) * jnp.maximum(iy2 - iy1 + 1.0, 0.0)
    a1 = (b1_x2 - b1_x1 + 1) * (b1_y2 - b1_y1 + 1)
    a2 = (b2_x2 - b2_x1 + 1) * (b2_y2 - b2_y1 + 1)
    return inter / (a1 + a2 - inter + 1e-16)


def build_targets_jax(pred_boxes, pred_cls, target, anchors, ignore_thres):
    nB, nA, nG = pred_boxes.shape[0], pred_boxes.shape[1], pred_boxes.shape[2]
    nC = pred_cls.shape[-1]
    nT = target.shape[0]
    f32 = jnp.float32

    target_boxes = target[:, 2:6] * nG
    gxy = target_boxes[:, :2]
    gwh = target_boxes[:, 2:]

    ious = _bbox_wh_iou(anchors, gwh)          # (nA, nT)
    best_n = jnp.argmax(ious, axis=0)          # (nT,)

    b = target[:, 0].astype(jnp.int32)
    labels = target[:, 1].astype(jnp.int32)
    gx, gy = gxy[:, 0], gxy[:, 1]
    gw, gh = gwh[:, 0], gwh[:, 1]
    gi = gx.astype(jnp.int32)
    gj = gy.astype(jnp.int32)

    zeros = jnp.zeros((nB, nA, nG, nG), f32)
    obj_mask = zeros.at[b, best_n, gj, gi].set(1.0)
    noobj_mask = jnp.ones((nB, nA, nG, nG), f32).at[b, best_n, gj, gi].set(0.0)
    ignore_val = jnp.where(ious.T > ignore_thres, 0.0, 1.0)   # (nT, nA)
    noobj_mask = noobj_mask.at[
        b[:, None], jnp.arange(nA)[None, :], gj[:, None], gi[:, None]].min(ignore_val)

    tx = zeros.at[b, best_n, gj, gi].set(gx - jnp.floor(gx))
    ty = zeros.at[b, best_n, gj, gi].set(gy - jnp.floor(gy))
    tw = zeros.at[b, best_n, gj, gi].set(jnp.log(gw / anchors[best_n, 0] + 1e-16))
    th = zeros.at[b, best_n, gj, gi].set(jnp.log(gh / anchors[best_n, 1] + 1e-16))

    pc_at = pred_cls[b, best_n, gj, gi]        # (nT, nC)
    class_mask = zeros.at[b, best_n, gj, gi].set(
        (jnp.argmax(pc_at, axis=-1) == labels).astype(f32))

    pb_at = pred_boxes[b, best_n, gj, gi]      # (nT, 4)
    iou_scores = zeros.at[b, best_n, gj, gi].set(_bbox_iou_xywh(pb_at, target_boxes))

    # ---- gather-based class-BCE sum over the nT object cells ----------------
    # Exactly reproduces BCELoss(pred_cls[obj], tcls[obj]).mean() * n_obj * nC
    # without ever materializing the (nB,nA,nG,nG,nC) one-hot tcls or shipping
    # 2*nC*N f32 class tensors through HBM: each *unique* object cell is counted
    # once, and duplicate targets landing on the same cell produce the same
    # multi-hot tcls the reference scatter would.
    flat_cell = ((b * nA + best_n) * nG + gj) * nG + gi          # (nT,)
    same = flat_cell[:, None] == flat_cell[None, :]
    one_hot = jax.nn.one_hot(labels, nC, dtype=f32)              # (nT, nC)
    tcls_at = jnp.minimum(same.astype(f32) @ one_hot, 1.0)       # multi-hot on dup cells
    earlier = jnp.sum(
        same & (jnp.arange(nT)[None, :] < jnp.arange(nT)[:, None]), axis=1)
    is_first = (earlier == 0).astype(f32)                        # count each cell once
    bce_cls = -(tcls_at * _clamped_log(pc_at)
                + (1.0 - tcls_at) * _clamped_log(1.0 - pc_at))
    cls_bce_sum = jnp.sum(is_first[:, None] * bce_cls)

    # tconf == obj_mask: not duplicated (the kernel reuses obj_mask directly).
    return (iou_scores, class_mask, obj_mask, noobj_mask,
            tx, ty, tw, th, cls_bce_sum)


# -----------------------------------------------------------------------------
# YoloLoss forward (wrapper around the Pallas kernel)
# -----------------------------------------------------------------------------
def yolo_loss(pred, targets, scaled_anchors, ignore_thresh=0.5):
    pred_x, pred_y, pred_w, pred_h, pred_conf, pred_cls, pred_boxes = pred
    gs = pred_x.shape[-1]
    nB, nA, nG = pred_x.shape[:3]
    nC = pred_cls.shape[-1]

    (iou_scores, class_mask, obj_mask, noobj_mask,
     tx, ty, tw, th, cls_bce_sum) = build_targets_jax(
        pred_boxes, pred_cls, targets, scaled_anchors, ignore_thresh)

    # ---- lane-dense layout: one stacked (8, R_pad, 128) f32 slab -------------
    N = nB * nA * nG * nG
    LANES = 128
    R = pl.cdiv(N, LANES)
    R8 = pl.cdiv(R, 8) * 8
    # Block rows: multiple of 8 sublanes, capped so each double-buffered block
    # stays ~1 MiB (fits comfortably in VMEM on v5e/v6e/v7x) while keeping the
    # ~0.35us-per-grid-step overhead amortized.
    MAX_BLOCK_ROWS = 256
    block_rows = min(R8, MAX_BLOCK_ROWS)
    R_pad = pl.cdiv(R8, block_rows) * block_rows
    N_pad = R_pad * LANES
    num_blocks = R_pad // block_rows

    # obj_mask and noobj_mask are disjoint -> pack into one signed map.
    objm = obj_mask - noobj_mask

    maps = [None] * _N_MAPS
    maps[_DX] = pred_x - tx
    maps[_DY] = pred_y - ty
    maps[_DW] = pred_w - tw
    maps[_DH] = pred_h - th
    maps[_PCONF] = pred_conf
    maps[_OBJM] = objm
    maps[_CLSM] = class_mask
    maps[_IOU] = iou_scores

    stacked = jnp.stack([m.reshape(-1).astype(jnp.float32) for m in maps], axis=0)
    # Zero padding keeps objm/pconf/iou/clsm = 0 in padded cells, so all kernel
    # reductions (incl. sum(conf50), sum(detected)) are unaffected.
    stacked = jnp.pad(stacked, ((0, 0), (0, N_pad - N)))
    stacked = stacked.reshape(_N_MAPS, R_pad, LANES)

    kernel = functools.partial(_yolo_loss_kernel, n_cls=nC)
    out = pl.pallas_call(
        kernel,
        out_shape=jax.ShapeDtypeStruct((16,), jnp.float32),
        grid_spec=pltpu.PrefetchScalarGridSpec(
            num_scalar_prefetch=0,
            grid=(num_blocks,),
            in_specs=[
                pl.BlockSpec((_N_MAPS, block_rows, LANES), lambda i: (0, i, 0)),
                pl.BlockSpec(memory_space=pltpu.MemorySpace.SMEM),   # cls BCE sum
            ],
            out_specs=pl.BlockSpec(memory_space=pltpu.MemorySpace.SMEM),
            scratch_shapes=[pltpu.SMEM((_N_ACC,), jnp.float32)],
        ),
        compiler_params=pltpu.CompilerParams(
            dimension_semantics=("arbitrary",)),   # sequential reduction axis
    )(stacked, cls_bce_sum.reshape(1))

    total_loss = out[0]
    metrics = {
        "loss": out[0], "x": out[1], "y": out[2], "w": out[3], "h": out[4],
        "conf": out[5], "cls": out[6], "cls_acc": out[7],
        "recall50": out[8], "recall75": out[9], "precision": out[10],
        "conf_obj": out[11], "conf_noobj": out[12], "grid_size": gs,
    }
    return total_loss, metrics


# -----------------------------------------------------------------------------
# Main: deterministic synthetic inputs
# -----------------------------------------------------------------------------
if __name__ == "__main__":
    nB, nA, nG, nC = 2, 3, 16, 4
    key = jax.random.PRNGKey(0)
    k = jax.random.split(key, 6)

    pred_x = jax.nn.sigmoid(jax.random.normal(k[0], (nB, nA, nG, nG), jnp.float32))
    pred_y = jax.nn.sigmoid(jax.random.normal(k[1], (nB, nA, nG, nG), jnp.float32))
    pred_w = 0.5 * jax.random.normal(k[2], (nB, nA, nG, nG), jnp.float32)
    pred_h = 0.5 * jax.random.normal(k[3], (nB, nA, nG, nG), jnp.float32)
    pred_conf = jax.nn.sigmoid(jax.random.normal(k[4], (nB, nA, nG, nG), jnp.float32))
    pred_cls = jax.nn.sigmoid(jax.random.normal(k[5], (nB, nA, nG, nG, nC), jnp.float32))

    # deterministic scaled anchors (nA, 2), in grid units
    scaled_anchors = jnp.array([[1.5, 2.0], [3.0, 4.5], [5.0, 3.5]], jnp.float32)

    # pred_boxes in grid units (decoded predictions)
    grid = jnp.arange(nG, dtype=jnp.float32)
    grid_x = grid[None, None, None, :]
    grid_y = grid[None, None, :, None]
    aw = scaled_anchors[:, 0][None, :, None, None]
    ah = scaled_anchors[:, 1][None, :, None, None]
    pred_boxes = jnp.stack(
        [pred_x + grid_x, pred_y + grid_y, jnp.exp(pred_w) * aw, jnp.exp(pred_h) * ah],
        axis=-1)

    # targets: (batch_idx, class, x, y, w, h) in normalized [0, 1] coords
    targets = jnp.array([
        [0.0, 1.0, 0.30, 0.40, 0.20, 0.30],
        [0.0, 2.0, 0.70, 0.60, 0.10, 0.20],
        [1.0, 0.0, 0.50, 0.50, 0.40, 0.30],
        [1.0, 3.0, 0.20, 0.80, 0.15, 0.25],
    ], dtype=jnp.float32)

    pred = (pred_x, pred_y, pred_w, pred_h, pred_conf, pred_cls, pred_boxes)
    total_loss, metrics = yolo_loss(pred, targets, scaled_anchors, ignore_thresh=0.5)
    jax.block_until_ready(total_loss)
    print("KERNEL_OK")
</pallas_src>

<mosaic_0001>
module attributes {stable_mosaic.version = 11 : i64} {
  func.func @_yolo_loss_kernel(%arg0: i32, %arg1: memref<8x16x128xf32, #tpu.memory_space<vmem>>, %arg2: memref<1xf32, #tpu.memory_space<smem>>, %arg3: memref<16xf32, #tpu.memory_space<smem>>, %arg4: memref<16xf32, #tpu.memory_space<smem>>) attributes {dimension_semantics = [#tpu.dimension_semantics<arbitrary>], iteration_bounds = array<i64: 1>, scalar_prefetch = 0 : i64, scratch_operands = 1 : i64, tpu.core_type = #tpu.core_type<tc>, window_params = [{transform_indices = @transform_0, window_bounds = array<i64: 8, 16, 128>}, {transform_indices = @transform_1, window_bounds = array<i64: 1>}, {transform_indices = @transform_2, window_bounds = array<i64: 16>}]} {
    %c0_i32 = arith.constant 0 : i32
    %0 = arith.cmpi eq, %arg0, %c0_i32 : i32
    %1 = arith.extui %0 : i1 to i32
    %c0_i32_0 = arith.constant 0 : i32
    %2 = arith.cmpi ne, %1, %c0_i32_0 : i32
    scf.if %2 {
      %cst_67 = arith.constant 0.000000e+00 : f32
      %c0_68 = arith.constant 0 : index
      %174 = memref.load %arg4[%c0_68] : memref<16xf32, #tpu.memory_space<smem>>
      memref.store %cst_67, %arg4[%c0_68] : memref<16xf32, #tpu.memory_space<smem>>
      %cst_69 = arith.constant 0.000000e+00 : f32
      %c1_70 = arith.constant 1 : index
      %175 = memref.load %arg4[%c1_70] : memref<16xf32, #tpu.memory_space<smem>>
      memref.store %cst_69, %arg4[%c1_70] : memref<16xf32, #tpu.memory_space<smem>>
      %cst_71 = arith.constant 0.000000e+00 : f32
      %c2_72 = arith.constant 2 : index
      %176 = memref.load %arg4[%c2_72] : memref<16xf32, #tpu.memory_space<smem>>
      memref.store %cst_71, %arg4[%c2_72] : memref<16xf32, #tpu.memory_space<smem>>
      %cst_73 = arith.constant 0.000000e+00 : f32
      %c3_74 = arith.constant 3 : index
      %177 = memref.load %arg4[%c3_74] : memref<16xf32, #tpu.memory_space<smem>>
      memref.store %cst_73, %arg4[%c3_74] : memref<16xf32, #tpu.memory_space<smem>>
      %cst_75 = arith.constant 0.000000e+00 : f32
      %c4_76 = arith.constant 4 : index
      %178 = memref.load %arg4[%c4_76] : memref<16xf32, #tpu.memory_space<smem>>
      memref.store %cst_75, %arg4[%c4_76] : memref<16xf32, #tpu.memory_space<smem>>
      %cst_77 = arith.constant 0.000000e+00 : f32
      %c5_78 = arith.constant 5 : index
      %179 = memref.load %arg4[%c5_78] : memref<16xf32, #tpu.memory_space<smem>>
      memref.store %cst_77, %arg4[%c5_78] : memref<16xf32, #tpu.memory_space<smem>>
      %cst_79 = arith.constant 0.000000e+00 : f32
      %c6_80 = arith.constant 6 : index
      %180 = memref.load %arg4[%c6_80] : memref<16xf32, #tpu.memory_space<smem>>
      memref.store %cst_79, %arg4[%c6_80] : memref<16xf32, #tpu.memory_space<smem>>
      %cst_81 = arith.constant 0.000000e+00 : f32
      %c7_82 = arith.constant 7 : index
      %181 = memref.load %arg4[%c7_82] : memref<16xf32, #tpu.memory_space<smem>>
      memref.store %cst_81, %arg4[%c7_82] : memref<16xf32, #tpu.memory_space<smem>>
      %cst_83 = arith.constant 0.000000e+00 : f32
      %c8_84 = arith.constant 8 : index
      %182 = memref.load %arg4[%c8_84] : memref<16xf32, #tpu.memory_space<smem>>
      memref.store %cst_83, %arg4[%c8_84] : memref<16xf32, #tpu.memory_space<smem>>
      %cst_85 = arith.constant 0.000000e+00 : f32
      %c9_86 = arith.constant 9 : index
      %183 = memref.load %arg4[%c9_86] : memref<16xf32, #tpu.memory_space<smem>>
      memref.store %cst_85, %arg4[%c9_86] : memref<16xf32, #tpu.memory_space<smem>>
      %cst_87 = arith.constant 0.000000e+00 : f32
      %c10_88 = arith.constant 10 : index
      %184 = memref.load %arg4[%c10_88] : memref<16xf32, #tpu.memory_space<smem>>
      memref.store %cst_87, %arg4[%c10_88] : memref<16xf32, #tpu.memory_space<smem>>
      %cst_89 = arith.constant 0.000000e+00 : f32
      %c11_90 = arith.constant 11 : index
      %185 = memref.load %arg4[%c11_90] : memref<16xf32, #tpu.memory_space<smem>>
      memref.store %cst_89, %arg4[%c11_90] : memref<16xf32, #tpu.memory_space<smem>>
      %cst_91 = arith.constant 0.000000e+00 : f32
      %c12_92 = arith.constant 12 : index
      %186 = memref.load %arg4[%c12_92] : memref<16xf32, #tpu.memory_space<smem>>
      memref.store %cst_91, %arg4[%c12_92] : memref<16xf32, #tpu.memory_space<smem>>
      %cst_93 = arith.constant 0.000000e+00 : f32
      %c13_94 = arith.constant 13 : index
      %187 = memref.load %arg4[%c13_94] : memref<16xf32, #tpu.memory_space<smem>>
      memref.store %cst_93, %arg4[%c13_94] : memref<16xf32, #tpu.memory_space<smem>>
      %cst_95 = arith.constant 0.000000e+00 : f32
      %c14_96 = arith.constant 14 : index
      %188 = memref.load %arg4[%c14_96] : memref<16xf32, #tpu.memory_space<smem>>
      memref.store %cst_95, %arg4[%c14_96] : memref<16xf32, #tpu.memory_space<smem>>
      %cst_97 = arith.constant 0.000000e+00 : f32
      %c15 = arith.constant 15 : index
      %189 = memref.load %arg4[%c15] : memref<16xf32, #tpu.memory_space<smem>>
      memref.store %cst_97, %arg4[%c15] : memref<16xf32, #tpu.memory_space<smem>>
    } else {
    }
    %c5 = arith.constant 5 : index
    %c0 = arith.constant 0 : index
    %c0_1 = arith.constant 0 : index
    %3 = vector.load %arg1[%c5, %c0, %c0_1] : memref<8x16x128xf32, #tpu.memory_space<vmem>>, vector<1x16x128xf32>
    %4 = vector.shape_cast %3 : vector<1x16x128xf32> to vector<16x128xf32>
    %cst = arith.constant 0.000000e+00 : f32
    %5 = vector.broadcast %cst : f32 to vector<16x128xf32>
    %6 = arith.maximumf %4, %5 : vector<16x128xf32>
    %cst_2 = arith.constant 0.000000e+00 : f32
    %7 = vector.broadcast %cst_2 : f32 to vector<16x128xf32>
    %8 = arith.subf %7, %4 : vector<16x128xf32>
    %cst_3 = arith.constant 0.000000e+00 : f32
    %9 = vector.broadcast %cst_3 : f32 to vector<16x128xf32>
    %10 = arith.maximumf %8, %9 : vector<16x128xf32>
    %c4 = arith.constant 4 : index
    %c0_4 = arith.constant 0 : index
    %c0_5 = arith.constant 0 : index
    %11 = vector.load %arg1[%c4, %c0_4, %c0_5] : memref<8x16x128xf32, #tpu.memory_space<vmem>>, vector<1x16x128xf32>
    %12 = vector.shape_cast %11 : vector<1x16x128xf32> to vector<16x128xf32>
    %c6 = arith.constant 6 : index
    %c0_6 = arith.constant 0 : index
    %c0_7 = arith.constant 0 : index
    %13 = vector.load %arg1[%c6, %c0_6, %c0_7] : memref<8x16x128xf32, #tpu.memory_space<vmem>>, vector<1x16x128xf32>
    %14 = vector.shape_cast %13 : vector<1x16x128xf32> to vector<16x128xf32>
    %c7 = arith.constant 7 : index
    %c0_8 = arith.constant 0 : index
    %c0_9 = arith.constant 0 : index
    %15 = vector.load %arg1[%c7, %c0_8, %c0_9] : memref<8x16x128xf32, #tpu.memory_space<vmem>>, vector<1x16x128xf32>
    %16 = vector.shape_cast %15 : vector<1x16x128xf32> to vector<16x128xf32>
    %c0_10 = arith.constant 0 : index
    %c0_11 = arith.constant 0 : index
    %c0_12 = arith.constant 0 : index
    %17 = vector.load %arg1[%c0_10, %c0_11, %c0_12] : memref<8x16x128xf32, #tpu.memory_space<vmem>>, vector<1x16x128xf32>
    %18 = vector.shape_cast %17 : vector<1x16x128xf32> to vector<16x128xf32>
    %c1 = arith.constant 1 : index
    %c0_13 = arith.constant 0 : index
    %c0_14 = arith.constant 0 : index
    %19 = vector.load %arg1[%c1, %c0_13, %c0_14] : memref<8x16x128xf32, #tpu.memory_space<vmem>>, vector<1x16x128xf32>
    %20 = vector.shape_cast %19 : vector<1x16x128xf32> to vector<16x128xf32>
    %c2 = arith.constant 2 : index
    %c0_15 = arith.constant 0 : index
    %c0_16 = arith.constant 0 : index
    %21 = vector.load %arg1[%c2, %c0_15, %c0_16] : memref<8x16x128xf32, #tpu.memory_space<vmem>>, vector<1x16x128xf32>
    %22 = vector.shape_cast %21 : vector<1x16x128xf32> to vector<16x128xf32>
    %c3 = arith.constant 3 : index
    %c0_17 = arith.constant 0 : index
    %c0_18 = arith.constant 0 : index
    %23 = vector.load %arg1[%c3, %c0_17, %c0_18] : memref<8x16x128xf32, #tpu.memory_space<vmem>>, vector<1x16x128xf32>
    %24 = vector.shape_cast %23 : vector<1x16x128xf32> to vector<16x128xf32>
    %25 = math.log %12 : vector<16x128xf32>
    %cst_19 = arith.constant -1.000000e+02 : f32
    %26 = vector.broadcast %cst_19 : f32 to vector<16x128xf32>
    %27 = arith.maximumf %25, %26 : vector<16x128xf32>
    %cst_20 = arith.constant 1.000000e+00 : f32
    %28 = vector.broadcast %cst_20 : f32 to vector<16x128xf32>
    %29 = arith.subf %28, %12 : vector<16x128xf32>
    %30 = math.log %29 : vector<16x128xf32>
    %cst_21 = arith.constant -1.000000e+02 : f32
    %31 = vector.broadcast %cst_21 : f32 to vector<16x128xf32>
    %32 = arith.maximumf %30, %31 : vector<16x128xf32>
    %cst_22 = arith.constant 5.000000e-01 : f32
    %33 = vector.broadcast %cst_22 : f32 to vector<16x128xf32>
    %34 = arith.cmpf ogt, %12, %33 : vector<16x128xf32>
    %35 = arith.extui %34 : vector<16x128xi1> to vector<16x128xi32>
    %36 = arith.sitofp %35 : vector<16x128xi32> to vector<16x128xf32>
    %cst_23 = arith.constant 5.000000e-01 : f32
    %37 = vector.broadcast %cst_23 : f32 to vector<16x128xf32>
    %38 = arith.cmpf ogt, %16, %37 : vector<16x128xf32>
    %39 = arith.extui %38 : vector<16x128xi1> to vector<16x128xi32>
    %40 = arith.sitofp %39 : vector<16x128xi32> to vector<16x128xf32>
    %cst_24 = arith.constant 7.500000e-01 : f32
    %41 = vector.broadcast %cst_24 : f32 to vector<16x128xf32>
    %42 = arith.cmpf ogt, %16, %41 : vector<16x128xf32>
    %43 = arith.extui %42 : vector<16x128xi1> to vector<16x128xi32>
    %44 = arith.sitofp %43 : vector<16x128xi32> to vector<16x128xf32>
    %45 = arith.mulf %36, %14 : vector<16x128xf32>
    %46 = arith.mulf %45, %6 : vector<16x128xf32>
    %c0_25 = arith.constant 0 : index
    %47 = memref.load %arg4[%c0_25] : memref<16xf32, #tpu.memory_space<smem>>
    %48 = vector.shape_cast %6 : vector<16x128xf32> to vector<1x16x128xf32>
    %cst_26 = arith.constant dense<0.000000e+00> : vector<1xf32>
    %49 = vector.multi_reduction <add>, %48, %cst_26 [1, 2] : vector<1x16x128xf32> to vector<1xf32>
    %50 = vector.shape_cast %49 : vector<1xf32> to vector<1x1x1xf32>
    %51 = vector.extract %50[0, 0, 0] : f32 from vector<1x1x1xf32>
    %52 = arith.addf %47, %51 : f32
    %c0_27 = arith.constant 0 : index
    %53 = memref.load %arg4[%c0_27] : memref<16xf32, #tpu.memory_space<smem>>
    memref.store %52, %arg4[%c0_27] : memref<16xf32, #tpu.memory_space<smem>>
    %c1_28 = arith.constant 1 : index
    %54 = memref.load %arg4[%c1_28] : memref<16xf32, #tpu.memory_space<smem>>
    %55 = vector.shape_cast %10 : vector<16x128xf32> to vector<1x16x128xf32>
    %cst_29 = arith.constant dense<0.000000e+00> : vector<1xf32>
    %56 = vector.multi_reduction <add>, %55, %cst_29 [1, 2] : vector<1x16x128xf32> to vector<1xf32>
    %57 = vector.shape_cast %56 : vector<1xf32> to vector<1x1x1xf32>
    %58 = vector.extract %57[0, 0, 0] : f32 from vector<1x1x1xf32>
    %59 = arith.addf %54, %58 : f32
    %c1_30 = arith.constant 1 : index
    %60 = memref.load %arg4[%c1_30] : memref<16xf32, #tpu.memory_space<smem>>
    memref.store %59, %arg4[%c1_30] : memref<16xf32, #tpu.memory_space<smem>>
    %c2_31 = arith.constant 2 : index
    %61 = memref.load %arg4[%c2_31] : memref<16xf32, #tpu.memory_space<smem>>
    %62 = arith.mulf %6, %18 : vector<16x128xf32>
    %63 = arith.mulf %62, %18 : vector<16x128xf32>
    %64 = vector.shape_cast %63 : vector<16x128xf32> to vector<1x16x128xf32>
    %cst_32 = arith.constant dense<0.000000e+00> : vector<1xf32>
    %65 = vector.multi_reduction <add>, %64, %cst_32 [1, 2] : vector<1x16x128xf32> to vector<1xf32>
    %66 = vector.shape_cast %65 : vector<1xf32> to vector<1x1x1xf32>
    %67 = vector.extract %66[0, 0, 0] : f32 from vector<1x1x1xf32>
    %68 = arith.addf %61, %67 : f32
    %c2_33 = arith.constant 2 : index
    %69 = memref.load %arg4[%c2_33] : memref<16xf32, #tpu.memory_space<smem>>
    memref.store %68, %arg4[%c2_33] : memref<16xf32, #tpu.memory_space<smem>>
    %c3_34 = arith.constant 3 : index
    %70 = memref.load %arg4[%c3_34] : memref<16xf32, #tpu.memory_space<smem>>
    %71 = arith.mulf %6, %20 : vector<16x128xf32>
    %72 = arith.mulf %71, %20 : vector<16x128xf32>
    %73 = vector.shape_cast %72 : vector<16x128xf32> to vector<1x16x128xf32>
    %cst_35 = arith.constant dense<0.000000e+00> : vector<1xf32>
    %74 = vector.multi_reduction <add>, %73, %cst_35 [1, 2] : vector<1x16x128xf32> to vector<1xf32>
    %75 = vector.shape_cast %74 : vector<1xf32> to vector<1x1x1xf32>
    %76 = vector.extract %75[0, 0, 0] : f32 from vector<1x1x1xf32>
    %77 = arith.addf %70, %76 : f32
    %c3_36 = arith.constant 3 : index
    %78 = memref.load %arg4[%c3_36] : memref<16xf32, #tpu.memory_space<smem>>
    memref.store %77, %arg4[%c3_36] : memref<16xf32, #tpu.memory_space<smem>>
    %c4_37 = arith.constant 4 : index
    %79 = memref.load %arg4[%c4_37] : memref<16xf32, #tpu.memory_space<smem>>
    %80 = arith.mulf %6, %22 : vector<16x128xf32>
    %81 = arith.mulf %80, %22 : vector<16x128xf32>
    %82 = vector.shape_cast %81 : vector<16x128xf32> to vector<1x16x128xf32>
    %cst_38 = arith.constant dense<0.000000e+00> : vector<1xf32>
    %83 = vector.multi_reduction <add>, %82, %cst_38 [1, 2] : vector<1x16x128xf32> to vector<1xf32>
    %84 = vector.shape_cast %83 : vector<1xf32> to vector<1x1x1xf32>
    %85 = vector.extract %84[0, 0, 0] : f32 from vector<1x1x1xf32>
    %86 = arith.addf %79, %85 : f32
    %c4_39 = arith.constant 4 : index
    %87 = memref.load %arg4[%c4_39] : memref<16xf32, #tpu.memory_space<smem>>
    memref.store %86, %arg4[%c4_39] : memref<16xf32, #tpu.memory_space<smem>>
    %c5_40 = arith.constant 5 : index
    %88 = memref.load %arg4[%c5_40] : memref<16xf32, #tpu.memory_space<smem>>
    %89 = arith.mulf %6, %24 : vector<16x128xf32>
    %90 = arith.mulf %89, %24 : vector<16x128xf32>
    %91 = vector.shape_cast %90 : vector<16x128xf32> to vector<1x16x128xf32>
    %cst_41 = arith.constant dense<0.000000e+00> : vector<1xf32>
    %92 = vector.multi_reduction <add>, %91, %cst_41 [1, 2] : vector<1x16x128xf32> to vector<1xf32>
    %93 = vector.shape_cast %92 : vector<1xf32> to vector<1x1x1xf32>
    %94 = vector.extract %93[0, 0, 0] : f32 from vector<1x1x1xf32>
    %95 = arith.addf %88, %94 : f32
    %c5_42 = arith.constant 5 : index
    %96 = memref.load %arg4[%c5_42] : memref<16xf32, #tpu.memory_space<smem>>
    memref.store %95, %arg4[%c5_42] : memref<16xf32, #tpu.memory_space<smem>>
    %c6_43 = arith.constant 6 : index
    %97 = memref.load %arg4[%c6_43] : memref<16xf32, #tpu.memory_space<smem>>
    %cst_44 = arith.constant 0.000000e+00 : f32
    %98 = vector.broadcast %cst_44 : f32 to vector<16x128xf32>
    %99 = arith.subf %98, %27 : vector<16x128xf32>
    %100 = arith.mulf %6, %99 : vector<16x128xf32>
    %101 = vector.shape_cast %100 : vector<16x128xf32> to vector<1x16x128xf32>
    %cst_45 = arith.constant dense<0.000000e+00> : vector<1xf32>
    %102 = vector.multi_reduction <add>, %101, %cst_45 [1, 2] : vector<1x16x128xf32> to vector<1xf32>
    %103 = vector.shape_cast %102 : vector<1xf32> to vector<1x1x1xf32>
    %104 = vector.extract %103[0, 0, 0] : f32 from vector<1x1x1xf32>
    %105 = arith.addf %97, %104 : f32
    %c6_46 = arith.constant 6 : index
    %106 = memref.load %arg4[%c6_46] : memref<16xf32, #tpu.memory_space<smem>>
    memref.store %105, %arg4[%c6_46] : memref<16xf32, #tpu.memory_space<smem>>
    %c7_47 = arith.constant 7 : index
    %107 = memref.load %arg4[%c7_47] : memref<16xf32, #tpu.memory_space<smem>>
    %cst_48 = arith.constant 0.000000e+00 : f32
    %108 = vector.broadcast %cst_48 : f32 to vector<16x128xf32>
    %109 = arith.subf %108, %32 : vector<16x128xf32>
    %110 = arith.mulf %10, %109 : vector<16x128xf32>
    %111 = vector.shape_cast %110 : vector<16x128xf32> to vector<1x16x128xf32>
    %cst_49 = arith.constant dense<0.000000e+00> : vector<1xf32>
    %112 = vector.multi_reduction <add>, %111, %cst_49 [1, 2] : vector<1x16x128xf32> to vector<1xf32>
    %113 = vector.shape_cast %112 : vector<1xf32> to vector<1x1x1xf32>
    %114 = vector.extract %113[0, 0, 0] : f32 from vector<1x1x1xf32>
    %115 = arith.addf %107, %114 : f32
    %c7_50 = arith.constant 7 : index
    %116 = memref.load %arg4[%c7_50] : memref<16xf32, #tpu.memory_space<smem>>
    memref.store %115, %arg4[%c7_50] : memref<16xf32, #tpu.memory_space<smem>>
    %c8 = arith.constant 8 : index
    %117 = memref.load %arg4[%c8] : memref<16xf32, #tpu.memory_space<smem>>
    %118 = arith.mulf %6, %14 : vector<16x128xf32>
    %119 = vector.shape_cast %118 : vector<16x128xf32> to vector<1x16x128xf32>
    %cst_51 = arith.constant dense<0.000000e+00> : vector<1xf32>
    %120 = vector.multi_reduction <add>, %119, %cst_51 [1, 2] : vector<1x16x128xf32> to vector<1xf32>
    %121 = vector.shape_cast %120 : vector<1xf32> to vector<1x1x1xf32>
    %122 = vector.extract %121[0, 0, 0] : f32 from vector<1x1x1xf32>
    %123 = arith.addf %117, %122 : f32
    %c8_52 = arith.constant 8 : index
    %124 = memref.load %arg4[%c8_52] : memref<16xf32, #tpu.memory_space<smem>>
    memref.store %123, %arg4[%c8_52] : memref<16xf32, #tpu.memory_space<smem>>
    %c9 = arith.constant 9 : index
    %125 = memref.load %arg4[%c9] : memref<16xf32, #tpu.memory_space<smem>>
    %126 = arith.mulf %6, %12 : vector<16x128xf32>
    %127 = vector.shape_cast %126 : vector<16x128xf32> to vector<1x16x128xf32>
    %cst_53 = arith.constant dense<0.000000e+00> : vector<1xf32>
    %128 = vector.multi_reduction <add>, %127, %cst_53 [1, 2] : vector<1x16x128xf32> to vector<1xf32>
    %129 = vector.shape_cast %128 : vector<1xf32> to vector<1x1x1xf32>
    %130 = vector.extract %129[0, 0, 0] : f32 from vector<1x1x1xf32>
    %131 = arith.addf %125, %130 : f32
    %c9_54 = arith.constant 9 : index
    %132 = memref.load %arg4[%c9_54] : memref<16xf32, #tpu.memory_space<smem>>
    memref.store %131, %arg4[%c9_54] : memref<16xf32, #tpu.memory_space<smem>>
    %c10 = arith.constant 10 : index
    %133 = memref.load %arg4[%c10] : memref<16xf32, #tpu.memory_space<smem>>
    %134 = arith.mulf %10, %12 : vector<16x128xf32>
    %135 = vector.shape_cast %134 : vector<16x128xf32> to vector<1x16x128xf32>
    %cst_55 = arith.constant dense<0.000000e+00> : vector<1xf32>
    %136 = vector.multi_reduction <add>, %135, %cst_55 [1, 2] : vector<1x16x128xf32> to vector<1xf32>
    %137 = vector.shape_cast %136 : vector<1xf32> to vector<1x1x1xf32>
    %138 = vector.extract %137[0, 0, 0] : f32 from vector<1x1x1xf32>
    %139 = arith.addf %133, %138 : f32
    %c10_56 = arith.constant 10 : index
    %140 = memref.load %arg4[%c10_56] : memref<16xf32, #tpu.memory_space<smem>>
    memref.store %139, %arg4[%c10_56] : memref<16xf32, #tpu.memory_space<smem>>
    %c11 = arith.constant 11 : index
    %141 = memref.load %arg4[%c11] : memref<16xf32, #tpu.memory_space<smem>>
    %142 = vector.shape_cast %36 : vector<16x128xf32> to vector<1x16x128xf32>
    %cst_57 = arith.constant dense<0.000000e+00> : vector<1xf32>
    %143 = vector.multi_reduction <add>, %142, %cst_57 [1, 2] : vector<1x16x128xf32> to vector<1xf32>
    %144 = vector.shape_cast %143 : vector<1xf32> to vector<1x1x1xf32>
    %145 = vector.extract %144[0, 0, 0] : f32 from vector<1x1x1xf32>
    %146 = arith.addf %141, %145 : f32
    %c11_58 = arith.constant 11 : index
    %147 = memref.load %arg4[%c11_58] : memref<16xf32, #tpu.memory_space<smem>>
    memref.store %146, %arg4[%c11_58] : memref<16xf32, #tpu.memory_space<smem>>
    %c12 = arith.constant 12 : index
    %148 = memref.load %arg4[%c12] : memref<16xf32, #tpu.memory_space<smem>>
    %149 = vector.shape_cast %46 : vector<16x128xf32> to vector<1x16x128xf32>
    %cst_59 = arith.constant dense<0.000000e+00> : vector<1xf32>
    %150 = vector.multi_reduction <add>, %149, %cst_59 [1, 2] : vector<1x16x128xf32> to vector<1xf32>
    %151 = vector.shape_cast %150 : vector<1xf32> to vector<1x1x1xf32>
    %152 = vector.extract %151[0, 0, 0] : f32 from vector<1x1x1xf32>
    %153 = arith.addf %148, %152 : f32
    %c12_60 = arith.constant 12 : index
    %154 = memref.load %arg4[%c12_60] : memref<16xf32, #tpu.memory_space<smem>>
    memref.store %153, %arg4[%c12_60] : memref<16xf32, #tpu.memory_space<smem>>
    %c13 = arith.constant 13 : index
    %155 = memref.load %arg4[%c13] : memref<16xf32, #tpu.memory_space<smem>>
    %156 = arith.mulf %40, %46 : vector<16x128xf32>
    %157 = vector.shape_cast %156 : vector<16x128xf32> to vector<1x16x128xf32>
    %cst_61 = arith.constant dense<0.000000e+00> : vector<1xf32>
    %158 = vector.multi_reduction <add>, %157, %cst_61 [1, 2] : vector<1x16x128xf32> to vector<1xf32>
    %159 = vector.shape_cast %158 : vector<1xf32> to vector<1x1x1xf32>
    %160 = vector.extract %159[0, 0, 0] : f32 from vector<1x1x1xf32>
    %161 = arith.addf %155, %160 : f32
    %c13_62 = arith.constant 13 : index
    %162 = memref.load %arg4[%c13_62] : memref<16xf32, #tpu.memory_space<smem>>
    memref.store %161, %arg4[%c13_62] : memref<16xf32, #tpu.memory_space<smem>>
    %c14 = arith.constant 14 : index
    %163 = memref.load %arg4[%c14] : memref<16xf32, #tpu.memory_space<smem>>
    %164 = arith.mulf %44, %46 : vector<16x128xf32>
    %165 = vector.shape_cast %164 : vector<16x128xf32> to vector<1x16x128xf32>
    %cst_63 = arith.constant dense<0.000000e+00> : vector<1xf32>
    %166 = vector.multi_reduction <add>, %165, %cst_63 [1, 2] : vector<1x16x128xf32> to vector<1xf32>
    %167 = vector.shape_cast %166 : vector<1xf32> to vector<1x1x1xf32>
    %168 = vector.extract %167[0, 0, 0] : f32 from vector<1x1x1xf32>
    %169 = arith.addf %163, %168 : f32
    %c14_64 = arith.constant 14 : index
    %170 = memref.load %arg4[%c14_64] : memref<16xf32, #tpu.memory_space<smem>>
    memref.store %169, %arg4[%c14_64] : memref<16xf32, #tpu.memory_space<smem>>
    %c0_i32_65 = arith.constant 0 : i32
    %171 = arith.cmpi eq, %arg0, %c0_i32_65 : i32
    %172 = arith.extui %171 : i1 to i32
    %c0_i32_66 = arith.constant 0 : i32
    %173 = arith.cmpi ne, %172, %c0_i32_66 : i32
    scf.if %173 {
      %c0_67 = arith.constant 0 : index
      %174 = memref.load %arg4[%c0_67] : memref<16xf32, #tpu.memory_space<smem>>
      %c1_68 = arith.constant 1 : index
      %175 = memref.load %arg4[%c1_68] : memref<16xf32, #tpu.memory_space<smem>>
      %cst_69 = arith.constant 1.000000e+00 : f32
      %176 = arith.divf %cst_69, %174 : f32
      %cst_70 = arith.constant 1.000000e+00 : f32
      %177 = arith.divf %cst_70, %175 : f32
      %c2_71 = arith.constant 2 : index
      %178 = memref.load %arg4[%c2_71] : memref<16xf32, #tpu.memory_space<smem>>
      %179 = arith.mulf %178, %176 : f32
      %c3_72 = arith.constant 3 : index
      %180 = memref.load %arg4[%c3_72] : memref<16xf32, #tpu.memory_space<smem>>
      %181 = arith.mulf %180, %176 : f32
      %c4_73 = arith.constant 4 : index
      %182 = memref.load %arg4[%c4_73] : memref<16xf32, #tpu.memory_space<smem>>
      %183 = arith.mulf %182, %176 : f32
      %c5_74 = arith.constant 5 : index
      %184 = memref.load %arg4[%c5_74] : memref<16xf32, #tpu.memory_space<smem>>
      %185 = arith.mulf %184, %176 : f32
      %c6_75 = arith.constant 6 : index
      %186 = memref.load %arg4[%c6_75] : memref<16xf32, #tpu.memory_space<smem>>
      %187 = arith.mulf %186, %176 : f32
      %c7_76 = arith.constant 7 : index
      %188 = memref.load %arg4[%c7_76] : memref<16xf32, #tpu.memory_space<smem>>
      %cst_77 = arith.constant 1.000000e+02 : f32
      %189 = arith.mulf %cst_77, %188 : f32
      %190 = arith.mulf %189, %177 : f32
      %191 = arith.addf %187, %190 : f32
      %c0_78 = arith.constant 0 : index
      %192 = memref.load %arg2[%c0_78] : memref<1xf32, #tpu.memory_space<smem>>
      %193 = arith.mulf %192, %176 : f32
      %cst_79 = arith.constant 2.500000e-01 : f32
      %194 = arith.mulf %193, %cst_79 : f32
      %195 = arith.addf %179, %181 : f32
      %196 = arith.addf %195, %183 : f32
      %197 = arith.addf %196, %185 : f32
      %198 = arith.addf %197, %191 : f32
      %199 = arith.addf %198, %194 : f32
      %c8_80 = arith.constant 8 : index
      %200 = memref.load %arg4[%c8_80] : memref<16xf32, #tpu.memory_space<smem>>
      %cst_81 = arith.constant 1.000000e+02 : f32
      %201 = arith.mulf %cst_81, %200 : f32
      %202 = arith.mulf %201, %176 : f32
      %c9_82 = arith.constant 9 : index
      %203 = memref.load %arg4[%c9_82] : memref<16xf32, #tpu.memory_space<smem>>
      %204 = arith.mulf %203, %176 : f32
      %c10_83 = arith.constant 10 : index
      %205 = memref.load %arg4[%c10_83] : memref<16xf32, #tpu.memory_space<smem>>
      %206 = arith.mulf %205, %177 : f32
      %c11_84 = arith.constant 11 : index
      %207 = memref.load %arg4[%c11_84] : memref<16xf32, #tpu.memory_space<smem>>
      %cst_85 = arith.constant 1.000000e-16 : f32
      %208 = arith.addf %207, %cst_85 : f32
      %cst_86 = arith.constant 1.000000e+00 : f32
      %209 = arith.divf %cst_86, %208 : f32
      %c12_87 = arith.constant 12 : index
      %210 = memref.load %arg4[%c12_87] : memref<16xf32, #tpu.memory_space<smem>>
      %cst_88 = arith.constant 1.000000e-16 : f32
      %211 = arith.addf %210, %cst_88 : f32
      %cst_89 = arith.constant 1.000000e+00 : f32
      %212 = arith.divf %cst_89, %211 : f32
      %c13_90 = arith.constant 13 : index
      %213 = memref.load %arg4[%c13_90] : memref<16xf32, #tpu.memory_space<smem>>
      %214 = arith.mulf %213, %209 : f32
      %c13_91 = arith.constant 13 : index
      %215 = memref.load %arg4[%c13_91] : memref<16xf32, #tpu.memory_space<smem>>
      %216 = arith.mulf %215, %212 : f32
      %c14_92 = arith.constant 14 : index
      %217 = memref.load %arg4[%c14_92] : memref<16xf32, #tpu.memory_space<smem>>
      %218 = arith.mulf %217, %212 : f32
      %c0_93 = arith.constant 0 : index
      %219 = memref.load %arg3[%c0_93] : memref<16xf32, #tpu.memory_space<smem>>
      memref.store %199, %arg3[%c0_93] : memref<16xf32, #tpu.memory_space<smem>>
      %c1_94 = arith.constant 1 : index
      %220 = memref.load %arg3[%c1_94] : memref<16xf32, #tpu.memory_space<smem>>
      memref.store %179, %arg3[%c1_94] : memref<16xf32, #tpu.memory_space<smem>>
      %c2_95 = arith.constant 2 : index
      %221 = memref.load %arg3[%c2_95] : memref<16xf32, #tpu.memory_space<smem>>
      memref.store %181, %arg3[%c2_95] : memref<16xf32, #tpu.memory_space<smem>>
      %c3_96 = arith.constant 3 : index
      %222 = memref.load %arg3[%c3_96] : memref<16xf32, #tpu.memory_space<smem>>
      memref.store %183, %arg3[%c3_96] : memref<16xf32, #tpu.memory_space<smem>>
      %c4_97 = arith.constant 4 : index
      %223 = memref.load %arg3[%c4_97] : memref<16xf32, #tpu.memory_space<smem>>
      memref.store %185, %arg3[%c4_97] : memref<16xf32, #tpu.memory_space<smem>>
      %c5_98 = arith.constant 5 : index
      %224 = memref.load %arg3[%c5_98] : memref<16xf32, #tpu.memory_space<smem>>
      memref.store %191, %arg3[%c5_98] : memref<16xf32, #tpu.memory_space<smem>>
      %c6_99 = arith.constant 6 : index
      %225 = memref.load %arg3[%c6_99] : memref<16xf32, #tpu.memory_space<smem>>
      memref.store %194, %arg3[%c6_99] : memref<16xf32, #tpu.memory_space<smem>>
      %c7_100 = arith.constant 7 : index
      %226 = memref.load %arg3[%c7_100] : memref<16xf32, #tpu.memory_space<smem>>
      memref.store %202, %arg3[%c7_100] : memref<16xf32, #tpu.memory_space<smem>>
      %c8_101 = arith.constant 8 : index
      %227 = memref.load %arg3[%c8_101] : memref<16xf32, #tpu.memory_space<smem>>
      memref.store %216, %arg3[%c8_101] : memref<16xf32, #tpu.memory_space<smem>>
      %c9_102 = arith.constant 9 : index
      %228 = memref.load %arg3[%c9_102] : memref<16xf32, #tpu.memory_space<smem>>
      memref.store %218, %arg3[%c9_102] : memref<16xf32, #tpu.memory_space<smem>>
      %c10_103 = arith.constant 10 : index
      %229 = memref.load %arg3[%c10_103] : memref<16xf32, #tpu.memory_space<smem>>
      memref.store %214, %arg3[%c10_103] : memref<16xf32, #tpu.memory_space<smem>>
      %c11_104 = arith.constant 11 : index
      %230 = memref.load %arg3[%c11_104] : memref<16xf32, #tpu.memory_space<smem>>
      memref.store %204, %arg3[%c11_104] : memref<16xf32, #tpu.memory_space<smem>>
      %c12_105 = arith.constant 12 : index
      %231 = memref.load %arg3[%c12_105] : memref<16xf32, #tpu.memory_space<smem>>
      memref.store %206, %arg3[%c12_105] : memref<16xf32, #tpu.memory_space<smem>>
      %cst_106 = arith.constant 0.000000e+00 : f32
      %c13_107 = arith.constant 13 : index
      %232 = memref.load %arg3[%c13_107] : memref<16xf32, #tpu.memory_space<smem>>
      memref.store %cst_106, %arg3[%c13_107] : memref<16xf32, #tpu.memory_space<smem>>
      %cst_108 = arith.constant 0.000000e+00 : f32
      %c14_109 = arith.constant 14 : index
      %233 = memref.load %arg3[%c14_109] : memref<16xf32, #tpu.memory_space<smem>>
      memref.store %cst_108, %arg3[%c14_109] : memref<16xf32, #tpu.memory_space<smem>>
      %cst_110 = arith.constant 0.000000e+00 : f32
      %c15 = arith.constant 15 : index
      %234 = memref.load %arg3[%c15] : memref<16xf32, #tpu.memory_space<smem>>
      memref.store %cst_110, %arg3[%c15] : memref<16xf32, #tpu.memory_space<smem>>
    } else {
    }
    return
  }
  func.func @transform_0(%arg0: i32) -> (i32, i32, i32) {
    %c0_i32 = arith.constant 0 : i32
    %c0_i32_0 = arith.constant 0 : i32
    %c0_i32_1 = arith.constant 0 : i32
    return %c0_i32, %arg0, %c0_i32_0 : i32, i32, i32
  }
  func.func @transform_1(%arg0: i32) -> i32 {
    %c0_i32 = arith.constant 0 : i32
    %c0_i32_0 = arith.constant 0 : i32
    return %c0_i32 : i32
  }
  func.func @transform_2(%arg0: i32) -> i32 {
    %c0_i32 = arith.constant 0 : i32
    %c0_i32_0 = arith.constant 0 : i32
    return %c0_i32 : i32
  }
}

</mosaic_0001>

<bundles_post_ra>
// kernel: tpu_custom_call.1
= control target key start
LH: loop header
LB: loop body
LE: loop exit
PB: predicated region body
PF: predicated region fallthrough
CT: control target
= control target key end

     0   :  { %8 = vsyncpa [#allocation5], 0  ;;  %s781_s0 = inlined_call_operand.hbm [shape: f32[8,16,128], index: 0, kind: input, shape index: {}]   ;;  %s782_s1 = inlined_call_operand.<no memory space> [shape: f32[1], index: 1, kind: input, shape index: {}]   ;;  %s783_s2 = inlined_call_operand.hbm [shape: f32[16], index: 2, kind: output, shape index: {}]  }
   0x1   :  { %9 = vsyncpa [#allocation6], 0  ;;  %s14_s11 = sshll.u32 %s781_s0, 4  ;;  %s663_s12 = smov [#allocation4]   ;;  %s15_s11 = int_to_ptr.hbm [resolvable:$true] %s14_s11 }
   0x2   :  { %s16_s13 = sshll.u32 %s663_s12, 4  ;;  %s664_s14 = smov 128   ;;  %s17_s13 = int_to_ptr.vmem [resolvable:$true] %s16_s13 }
   0x3   :  { %s665_s15 = smov 8  }
   0x4   :  { %22 = dma.hbm_to_vmem [thread:$0]  %s15_s11, 2048, %s17_s13, [#allocation5], %s664_s14, %s664_s14, %s665_s15  }
   0x5   :  { %659 = dma.done.wait [#allocation5], 2048  }
   0x6   :  { %660 = vsyncadd [#allocation5], 4294965248  ;;  %v66_v0 = vld [vmem:[#allocation4 + $0x50] sm:$0xff]  ;;  %v67_v1 = vld [vmem:[#allocation4 + $0x58] sm:$0xff]  ;;  %s667_s0 = smov 0.0  }
   0x7   :  { %v687_v2 = vld [vmem:[#allocation4 + $0x60] sm:$0xff]  ;;  %v689_v3 = vmax.f32 %v66_v0, 0.0  ;;  %v691_v4 = vmax.f32 %v67_v1, 0.0  ;;  %v693_v5 = vld [vmem:[#allocation4 + $0x68] sm:$0xff]  ;;  %v70_v8 = vsub.f32 0.0, %v66_v0  ;;  %v71_v9 = vsub.f32 0.0, %v67_v1 }
   0x8   :  { %v83_v6 = vld [vmem:[#allocation4] sm:$0xff]  ;;  %v84_v7 = vld [vmem:[#allocation4 + $0x8] sm:$0xff]  ;;  %v86_v16 = vld [vmem:[#allocation4 + $0x10] sm:$0xff]  ;;  %508 = sst [smem:[#allocation7 + $0xd]] %s667_s0 }
   0x9   :  { %v89_v10 = vld [vmem:[#allocation4 + $0x20] sm:$0xff]  ;;  %v90_v11 = vld [vmem:[#allocation4 + $0x28] sm:$0xff]  ;;  %v131_v12 = vadd.f32 %v691_v4, %v689_v3  ;;  %v267_v13 = vmul.f32 %v687_v2, %v689_v3  ;;  %v268_v14 = vmul.f32 %v693_v5, %v691_v4  ;;  %v159_v15 = vmul.f32 %v83_v6, %v689_v3  ;;  %v87_v17 = vld [vmem:[#allocation4 + $0x18] sm:$0xff]  ;;  %510 = sst [smem:[#allocation7 + $0xe]] %s667_s0 }
   0xa   :  { %v160_v18 = vmul.f32 %v84_v7, %v691_v4  ;;  %v703_v19 = vmax.f32 %v70_v8, 0.0  ;;  %v195_v20 = vmul.f32 %v89_v10, %v689_v3  ;;  %v706_v23 = vmax.f32 %v71_v9, 0.0  ;;  %v711_v28 = vld [vmem:[#allocation4 + $0x40] sm:$0xff]  ;;  %v713_v29 = vld [vmem:[#allocation4 + $0x48] sm:$0xff]  ;;  %v92_v33 = vld [vmem:[#allocation4 + $0x30] sm:$0xff]  ;;  %512 = sst [smem:[#allocation7 + $0xf]] %s667_s0 }
   0xb   :  { %132 = vadd.xlane.f32.xlu0 %v131_v12  ;;  %v269_v21 = vadd.f32 %v268_v14, %v267_v13  ;;  %v161_v22 = vmul.f32 %v159_v15, %v83_v6  ;;  %v196_v24 = vmul.f32 %v90_v11, %v691_v4  ;;  %v177_v26 = vmul.f32 %v86_v16, %v689_v3  ;;  %v93_v34 = vld [vmem:[#allocation4 + $0x38] sm:$0xff]  ;;  %v81_v0 = vld [vmem:[#allocation4 + $0x70] sm:$0xff] }
   0xc   :  { %v162_v25 = vmul.f32 %v160_v18, %v84_v7  ;;  %v178_v27 = vmul.f32 %v87_v17, %v691_v4  ;;  %v197_v30 = vmul.f32 %v195_v20, %v89_v10  ;;  %v145_v35 = vadd.f32 %v706_v23, %v703_v19  ;;  %v82_v1 = vld [vmem:[#allocation4 + $0x78] sm:$0xff] }
   0xd   :  { %270 = vadd.xlane.f32.xlu2 %v269_v21  ;;  %v198_v31 = vmul.f32 %v196_v24, %v90_v11  ;;  %v100_v36 = vsub.f32 1.0, %v711_v28  ;;  %v101_v37 = vsub.f32 1.0, %v713_v29  ;;  %v179_v38 = vmul.f32 %v177_v26, %v86_v16 }
   0xe   :  { %v163_v32 = vadd.f32 %v162_v25, %v161_v22  ;;  %v180_v39 = vmul.f32 %v178_v27, %v87_v17  ;;  %607 = vlog2.f32 %v711_v28  ;;  %v213_v41 = vmul.f32 %v92_v33, %v689_v3 }
   0xf   :  { %v199_v40 = vadd.f32 %v198_v31, %v197_v30  ;;  %v214_v42 = vmul.f32 %v93_v34, %v691_v4  ;;  %609 = vlog2.f32 %v100_v36  ;;  %v283_v43 = vmul.f32 %v711_v28, %v689_v3 }
  0x10   :  { %164 = vadd.xlane.f32.xlu1 %v163_v32  ;;  %611 = vlog2.f32 %v101_v37  ;;  %v284_v44 = vmul.f32 %v713_v29, %v691_v4  ;;  %v181_v45 = vadd.f32 %v180_v39, %v179_v38  ;;  %v215_v46 = vmul.f32 %v213_v41, %v92_v33 }
  0x11   :  { %613 = vlog2.f32 %v713_v29  ;;  %v216_v47 = vmul.f32 %v214_v42, %v93_v34  ;;  %vm108_vm0 = vcmp.gt.f32.partialorder %v711_v28, 0.5  ;;  %vm109_vm1 = vcmp.gt.f32.partialorder %v713_v29, 0.5 }
  0x12   :  { %v285_v50 = vadd.f32 %v284_v44, %v283_v43  ;;  %v666_v7 = vmov 0.0   ;;  %vm120_vm2 = vcmp.gt.f32.partialorder %v81_v0, 0.75  ;;  %vm121_vm3 = vcmp.gt.f32.partialorder %v82_v1, 0.75 }
  0x13   :  { %146 = vadd.xlane.f32.xlu0 %v145_v35  ;;  %v217_v55 = vadd.f32 %v216_v47, %v215_v46  ;;  %v529_v8 = vsel %vm108_vm0, 1.0, %v666_v7  ;;  %v530_v9 = vsel %vm109_vm1, 1.0, %v666_v7  ;;  %v533_v21 = vsel %vm120_vm2, 1.0, %v666_v7 }
  0x14   :  { %v608_v48 = vpop.eup %607  ;;  %v126_v13 = vmul.f32 %v529_v8, %v687_v2  ;;  %v127_v15 = vmul.f32 %v530_v9, %v693_v5  ;;  %v315_v18 = vadd.f32 %v530_v9, %v529_v8  ;;  %v534_v22 = vsel %vm121_vm3, 1.0, %v666_v7 }
  0x15   :  { %200 = vadd.xlane.f32.xlu2 %v199_v40  ;;  %v610_v49 = vpop.eup %609  ;;  %v95_v51 = vmul.f32 0.6931472, %v608_v48  ;;  %v299_v2 = vmul.f32 %v711_v28, %v703_v19  ;;  %v300_v5 = vmul.f32 %v713_v29, %v706_v23  ;;  %vm114_vm4 = vcmp.gt.f32.partialorder %v81_v0, 0.5 }
  0x16   :  { %v612_v52 = vpop.eup %611  ;;  %v103_v53 = vmul.f32 0.6931472, %v610_v49  ;;  %v129_v24 = vmul.f32 %v127_v15, %v691_v4  ;;  %v128_v25 = vmul.f32 %v126_v13, %v689_v3  ;;  %vm115_vm5 = vcmp.gt.f32.partialorder %v82_v1, 0.5 }
  0x17   :  { %v614_v54 = vpop.eup %613  ;;  %v105_v56 = vmul.f32 0.6931472, %v612_v52  ;;  %v98_v57 = vmax.f32 %v95_v51, -100.0  ;;  %v301_v30 = vadd.f32 %v300_v5, %v299_v2  ;;  %v531_v32 = vsel %vm114_vm4, 1.0, %v666_v7 }
  0x18   :  { %182 = vadd.xlane.f32.xlu1 %v181_v45  ;;  %v106_v58 = vmax.f32 %v103_v53, -100.0  ;;  %v97_v59 = vmul.f32 0.6931472, %v614_v54  ;;  %v359_v26 = vmul.f32 %v533_v21, %v128_v25  ;;  %v360_v27 = vmul.f32 %v534_v22, %v129_v24 }
  0x19   :  { %v107_v60 = vmax.f32 %v105_v56, -100.0  ;;  %v231_v61 = vsub.f32 0.0, %v98_v57  ;;  %v329_v31 = vadd.f32 %v129_v24, %v128_v25  ;;  %v532_v33 = vsel %vm115_vm5, 1.0, %v666_v7 }
  0x1a   :  { %v249_v62 = vsub.f32 0.0, %v106_v58  ;;  %v99_v63 = vmax.f32 %v97_v59, -100.0  ;;  %v361_v34 = vadd.f32 %v360_v27, %v359_v26 }
  0x1b   :  { %286 = vadd.xlane.f32.xlu0 %v285_v50  ;;  %v250_v6 = vsub.f32 0.0, %v107_v60  ;;  %v233_v12 = vmul.f32 %v231_v61, %v689_v3  ;;  %v344_v3 = vmul.f32 %v532_v33, %v129_v24 }
  0x1c   :  { %v251_v10 = vmul.f32 %v249_v62, %v703_v19  ;;  %v232_v11 = vsub.f32 0.0, %v99_v63 }
  0x1d   :  { %218 = vadd.xlane.f32.xlu2 %v217_v55  ;;  %v252_v14 = vmul.f32 %v250_v6, %v706_v23 }
  0x1e   :  { %v234_v16 = vmul.f32 %v232_v11, %v691_v4  ;;  %v343_v4 = vmul.f32 %v531_v32, %v128_v25 }
  0x1f   :  { %v253_v17 = vadd.f32 %v252_v14, %v251_v10 }
  0x20   :  { %v235_v20 = vadd.f32 %v234_v16, %v233_v12  ;;  %v345_v19 = vadd.f32 %v344_v3, %v343_v4 }
  0x21   :  { %254 = vadd.xlane.f32.xlu1 %v253_v17 }
  0x23   :  { %236 = vadd.xlane.f32.xlu0 %v235_v20 }
  0x25   :  { %316 = vadd.xlane.f32.xlu2 %v315_v18 }
  0x29   :  { %302 = vadd.xlane.f32.xlu1 %v301_v30 }
  0x2b   :  { %330 = vadd.xlane.f32.xlu0 %v329_v31 }
  0x2d   :  { %362 = vadd.xlane.f32.xlu2 %v361_v34 }
  0x31   :  { %346 = vadd.xlane.f32.xlu1 %v345_v19 }
  0x7e   :  { %v133_v28 = vpop.xlane.xlu0 %132 }
  0x7f   :  { %v134_v23 = vrot.slane %v133_v28, 4 }
  0x80   :  { %v271_v29 = vpop.xlane.xlu2 %270 }
  0x81   :  { %v135_v35 = vadd.f32 %v134_v23, %v133_v28  ;;  %v272_v61 = vrot.slane %v271_v29, 4 }
  0x83   :  { %v136_v36 = vrot.slane %v135_v35, 2  ;;  %v165_v37 = vpop.xlane.xlu1 %164  ;;  %v273_v11 = vadd.f32 %v272_v61, %v271_v29 }
  0x84   :  { %v166_v38 = vrot.slane %v165_v37, 4 }
  0x85   :  { %v137_v39 = vadd.f32 %v136_v36, %v135_v35  ;;  %v274_v22 = vrot.slane %v273_v11, 2 }
  0x86   :  { %v167_v40 = vadd.f32 %v166_v38, %v165_v37  ;;  %v147_v41 = vpop.xlane.xlu0 %146 }
  0x87   :  { %v148_v42 = vrot.slane %v147_v41, 4  ;;  %v138_v43 = vrot.slane %v137_v39, 1  ;;  %v275_v4 = vadd.f32 %v274_v22, %v273_v11 }
  0x88   :  { %v168_v44 = vrot.slane %v167_v40, 2  ;;  %v201_v45 = vpop.xlane.xlu2 %200 }
  0x89   :  { %v149_v46 = vadd.f32 %v148_v42, %v147_v41  ;;  %v202_v47 = vrot.slane %v201_v45, 4  ;;  %v139_v48 = vadd.f32 %v138_v43, %v137_v39 }
  0x8a   :  { %v169_v49 = vadd.f32 %v168_v44, %v167_v40  ;;  %v276_v40 = vrot.slane %v275_v4, 1 }
  0x8b   :  { %v150_v50 = vrot.slane %v149_v46, 2  ;;  %v203_v51 = vadd.f32 %v202_v47, %v201_v45  ;;  %v183_v52 = vpop.xlane.xlu1 %182  ;;  %563 = vpush %v139_v48 }
  0x8c   :  { %v184_v53 = vrot.slane %v183_v52, 4  ;;  %v170_v58 = vrot.slane %v169_v49, 1 }
  0x8d   :  { %v204_v54 = vrot.slane %v203_v51, 2  ;;  %v151_v55 = vadd.f32 %v150_v50, %v149_v46 }
  0x8e   :  { %v185_v56 = vadd.f32 %v184_v53, %v183_v52  ;;  %v287_v57 = vpop.xlane.xlu0 %286  ;;  %v171_v7 = vadd.f32 %v170_v58, %v169_v49  ;;  %v277_v49 = vadd.f32 %v276_v40, %v275_v4 }
  0x8f   :  { %v152_v59 = vrot.slane %v151_v55, 1  ;;  %v205_v60 = vadd.f32 %v204_v54, %v203_v51  ;;  %v288_v0 = vrot.slane %v287_v57, 4 }
  0x90   :  { %v186_v62 = vrot.slane %v185_v56, 2  ;;  %v219_v63 = vpop.xlane.xlu2 %218 }
  0x91   :  { %v220_v1 = vrot.slane %v219_v63, 4  ;;  %v153_v6 = vadd.f32 %v152_v59, %v151_v55  ;;  %v206_v10 = vrot.slane %v205_v60, 1  ;;  %v289_v13 = vadd.f32 %v288_v0, %v287_v57 }
  0x92   :  { %v187_v8 = vadd.f32 %v186_v62, %v185_v56 }
  0x93   :  { %v221_v9 = vadd.f32 %v220_v1, %v219_v63  ;;  %565 = vpush %v153_v6  ;;  %v207_v20 = vadd.f32 %v206_v10, %v205_v60  ;;  %v290_v2 = vrot.slane %v289_v13, 2 }
  0x94   :  { %567 = vpush %v171_v7  ;;  %v188_v12 = vrot.slane %v187_v8, 1  ;;  %v255_v15 = vpop.xlane.xlu1 %254 }
  0x95   :  { %v222_v14 = vrot.slane %v221_v9, 2  ;;  %v256_v17 = vrot.slane %v255_v15, 4  ;;  %v291_v19 = vadd.f32 %v290_v2, %v289_v13 }
  0x96   :  { %v189_v16 = vadd.f32 %v188_v12, %v187_v8  ;;  %v237_v18 = vpop.xlane.xlu0 %236 }
  0x97   :  { %v223_v21 = vadd.f32 %v222_v14, %v221_v9  ;;  %v238_v24 = vrot.slane %v237_v18, 4  ;;  %v257_v5 = vadd.f32 %v256_v17, %v255_v15  ;;  %v292_v42 = vrot.slane %v291_v19, 1 }
  0x98   :  { %569 = vpush %v189_v16  ;;  %v317_v25 = vpop.xlane.xlu2 %316 }
  0x99   :  { %571 = vpush %v207_v20  ;;  %v318_v26 = vrot.slane %v317_v25, 4  ;;  %v224_v27 = vrot.slane %v223_v21, 1  ;;  %v239_v30 = vadd.f32 %v238_v24, %v237_v18  ;;  %v258_v31 = vrot.slane %v257_v5, 2 }
  0x9a   :  { %v293_v50 = vadd.f32 %v292_v42, %v291_v19 }
  0x9b   :  { %v319_v32 = vadd.f32 %v318_v26, %v317_v25  ;;  %v225_v33 = vadd.f32 %v224_v27, %v223_v21  ;;  %v240_v34 = vrot.slane %v239_v30, 2  ;;  %v259_v3 = vadd.f32 %v258_v31, %v257_v5 }
  0x9c   :  { %v303_v23 = vpop.xlane.xlu1 %302 }
  0x9d   :  { %573 = vpush %v225_v33  ;;  %v320_v28 = vrot.slane %v319_v32, 2  ;;  %v241_v29 = vadd.f32 %v240_v34, %v239_v30  ;;  %v304_v35 = vrot.slane %v303_v23, 4  ;;  %v260_v37 = vrot.slane %v259_v3, 1 }
  0x9e   :  { %v331_v36 = vpop.xlane.xlu0 %330 }
  0x9f   :  { %v332_v38 = vrot.slane %v331_v36, 4  ;;  %v242_v39 = vrot.slane %v241_v29, 1  ;;  %v305_v41 = vadd.f32 %v304_v35, %v303_v23  ;;  %v321_v45 = vadd.f32 %v320_v28, %v319_v32 }
  0xa0   :  { %v261_v47 = vadd.f32 %v260_v37, %v259_v3  ;;  %v363_v55 = vpop.xlane.xlu2 %362 }
  0xa1   :  { %v333_v43 = vadd.f32 %v332_v38, %v331_v36  ;;  %v243_v44 = vadd.f32 %v242_v39, %v241_v29  ;;  %v306_v46 = vrot.slane %v305_v41, 2  ;;  %v322_v53 = vrot.slane %v321_v45, 1 }
  0xa2   :  { %v364_v58 = vrot.slane %v363_v55, 4 }
  0xa3   :  { %v334_v48 = vrot.slane %v333_v43, 2  ;;  %575 = vpush %v243_v44  ;;  %v307_v51 = vadd.f32 %v306_v46, %v305_v41  ;;  %v323_v61 = vadd.f32 %v322_v53, %v321_v45 }
  0xa4   :  { %577 = vpush %v261_v47  ;;  %v347_v56 = vpop.xlane.xlu1 %346  ;;  %v365_v63 = vadd.f32 %v364_v58, %v363_v55 }
  0xa5   :  { %v335_v52 = vadd.f32 %v334_v48, %v333_v43  ;;  %579 = vpush %v277_v49  ;;  %v308_v54 = vrot.slane %v307_v51, 1  ;;  %v348_v59 = vrot.slane %v347_v56, 4 }
  0xa6   :  { %581 = vpush %v293_v50  ;;  %v366_v1 = vrot.slane %v365_v63, 2 }
  0xa7   :  { %v336_v57 = vrot.slane %v335_v52, 1  ;;  %v309_v60 = vadd.f32 %v308_v54, %v307_v51  ;;  %v349_v0 = vadd.f32 %v348_v59, %v347_v56 }
  0xa8   :  { %v367_v7 = vadd.f32 %v366_v1, %v365_v63 }
  0xa9   :  { %v337_v62 = vadd.f32 %v336_v57, %v335_v52  ;;  %583 = vpush %v309_v60  ;;  %v350_v6 = vrot.slane %v349_v0, 2 }
  0xaa   :  { %585 = vpush %v323_v61  ;;  %v368_v10 = vrot.slane %v367_v7, 1 }
  0xab   :  { %587 = vpush %v337_v62  ;;  %v351_v8 = vadd.f32 %v350_v6, %v349_v0 }
  0xac   :  { %v369_v12 = vadd.f32 %v368_v10, %v367_v7 }
  0xad   :  { %v352_v9 = vrot.slane %v351_v8, 1 }
  0xaf   :  { %v353_v11 = vadd.f32 %v352_v9, %v351_v8 }
  0xb1   :  { %589 = vpush %v353_v11 }
  0xb2   :  { %591 = vpush %v369_v12 }
  0xbc   :  { %s564_s16 = spop %563 }
  0xbd   :  { %v379_v13 = vstv %s564_s16 }
  0xbe   :  { %615 = vrcp.f32 %v379_v13  ;;  %v391_v18 = vand.u32 2147483648, %v379_v13  ;;  %v389_v21 = vand.u32 2147483647, %v379_v13  ;;  %vm385_vm7 = vweird.f32 %v379_v13 }
  0xc0   :  { %v392_v25 = vor.u32 1.1754944e-38, %v391_v18  ;;  %vm390_vm9 = vcmp.eq.f32.partialorder %v389_v21, 8.507059e+37 }
  0xc4   :  { %v616_v14 = vpop.eup %615  ;;  %s566_s17 = spop %565 }
  0xc5   :  { %v381_v15 = vmul.f32 %v616_v14, %v379_v13  ;;  %v395_v16 = vstv %s566_s17  ;;  %vm386_vm6 = vweird.f32 %v616_v14  ;;  %s741_s18 = spop %567 }
  0xc6   :  { %617 = vrcp.f32 %v395_v16  ;;  %vm387_vm8 = vmor %vm385_vm7, %vm386_vm6  ;;  %v407_v30 = vand.u32 2147483648, %v395_v16  ;;  %v405_v32 = vand.u32 2147483647, %v395_v16  ;;  %vm401_vm11 = vweird.f32 %v395_v16 }
  0xc7   :  { %v382_v17 = vsub.f32 1.0, %v381_v15 }
  0xc8   :  { %v408_v34 = vor.u32 1.1754944e-38, %v407_v30  ;;  %vm406_vm13 = vcmp.eq.f32.partialorder %v405_v32, 8.507059e+37 }
  0xc9   :  { %v383_v20 = vmul.f32 %v616_v14, %v382_v17  ;;  %s743_s19 = spop %569 }
  0xca   :  { %s745_s20 = spop %571 }
  0xcb   :  { %v384_v22 = vadd.f32 %v616_v14, %v383_v20 }
  0xcc   :  { %v618_v24 = vpop.eup %617 }
  0xcd   :  { %v397_v2 = vmul.f32 %v618_v24, %v395_v16  ;;  %v388_v5 = vsel %vm387_vm8, %v616_v14, %v384_v22  ;;  %vm402_vm10 = vweird.f32 %v618_v24 }
  0xce   :  { %v393_v26 = vsel %vm390_vm9, %v392_v25, %v388_v5  ;;  %s747_s21 = spop %573  ;;  %vm403_vm12 = vmor %vm401_vm11, %vm402_vm10 }
  0xcf   :  { %v398_v27 = vsub.f32 1.0, %v397_v2  ;;  %593 = vpush %v393_v26 }
  0xd1   :  { %v399_v31 = vmul.f32 %v618_v24, %v398_v27 }
  0xd3   :  { %v400_v33 = vadd.f32 %v618_v24, %v399_v31 }
  0xd4   :  { %s749_s22 = spop %575 }
  0xd5   :  { %v404_v4 = vsel %vm403_vm12, %v618_v24, %v400_v33  ;;  %s751_s23 = spop %577 }
  0xd6   :  { %v409_v3 = vsel %vm406_vm13, %v408_v34, %v404_v4  ;;  %s753_s24 = spop %579  ;;  %s422_s6 = smul.f32 100.0, %s751_s23 }
  0xd7   :  { %595 = vpush %v409_v3  ;;  %s755_s25 = spop %581  ;;  %s434_s5 = smul.f32 100.0, %s753_s24 }
  0xda   :  { %s757_s26 = spop %583 }
  0xdb   :  { %s586_s27 = spop %585 }
  0xdc   :  { %s441_s28 = sadd.f32 1e-16, %s586_s27  ;;  %s588_s29 = spop %587 }
  0xdd   :  { %s459_s30 = sadd.f32 1e-16, %s588_s29 }
  0xde   :  { %v442_v19 = vstv %s441_s28 }
  0xdf   :  { %619 = vrcp.f32 %v442_v19  ;;  %v460_v28 = vstv %s459_s30  ;;  %v454_v39 = vand.u32 2147483648, %v442_v19  ;;  %v452_v41 = vand.u32 2147483647, %v442_v19 }
  0xe0   :  { %621 = vrcp.f32 %v460_v28  ;;  %v472_v42 = vand.u32 2147483648, %v460_v28  ;;  %v470_v44 = vand.u32 2147483647, %v460_v28  ;;  %vm448_vm0 = vweird.f32 %v442_v19 }
  0xe1   :  { %v455_v46 = vor.u32 1.1754944e-38, %v454_v39  ;;  %vm466_vm2 = vweird.f32 %v460_v28  ;;  %vm453_vm3 = vcmp.eq.f32.partialorder %v452_v41, 8.507059e+37 }
  0xe2   :  { %v473_v49 = vor.u32 1.1754944e-38, %v472_v42  ;;  %vm471_vm5 = vcmp.eq.f32.partialorder %v470_v44, 8.507059e+37  ;;  %s759_s3 = spop %589 }
  0xe3   :  { %s761_s4 = spop %591 }
  0xe5   :  { %v620_v23 = vpop.eup %619 }
  0xe6   :  { %v622_v29 = vpop.eup %621  ;;  %v444_v35 = vmul.f32 %v620_v23, %v442_v19  ;;  %vm449_vm14 = vweird.f32 %v620_v23 }
  0xe7   :  { %v462_v36 = vmul.f32 %v622_v29, %v460_v28  ;;  %vm467_vm15 = vweird.f32 %v622_v29  ;;  %vm450_vm1 = vmor %vm448_vm0, %vm449_vm14 }
  0xe8   :  { %v445_v37 = vsub.f32 1.0, %v444_v35  ;;  %vm468_vm4 = vmor %vm466_vm2, %vm467_vm15 }
  0xe9   :  { %v463_v38 = vsub.f32 1.0, %v462_v36 }
  0xea   :  { %v446_v40 = vmul.f32 %v620_v23, %v445_v37 }
  0xeb   :  { %v464_v43 = vmul.f32 %v622_v29, %v463_v38 }
  0xec   :  { %v447_v45 = vadd.f32 %v620_v23, %v446_v40 }
  0xed   :  { %v465_v47 = vadd.f32 %v622_v29, %v464_v43 }
  0xee   :  { %v451_v48 = vsel %vm450_vm1, %v620_v23, %v447_v45 }
  0xef   :  { %v456_v50 = vsel %vm453_vm3, %v455_v46, %v451_v48  ;;  %v469_v51 = vsel %vm468_vm4, %v622_v29, %v465_v47 }
  0xf0   :  { %597 = vpush %v456_v50  ;;  %v474_v52 = vsel %vm471_vm5, %v473_v49, %v469_v51 }
  0xf1   :  { %599 = vpush %v474_v52 }
 0x100   :  { %s594_s7 = spop %593 }
 0x101   :  { %s435_s8 = smul.f32 %s594_s7, %s434_s5 }
 0x102   :  { %s437_s9 = smul.f32 %s594_s7, %s755_s25 }
 0x103   :  { %496 = sst [smem:[#allocation7 + $0x7]] %s435_s8  ;;  %s412_s10 = smul.f32 %s594_s7, %s741_s18 }
 0x104   :  { %504 = sst [smem:[#allocation7 + $0xb]] %s437_s9  ;;  %s414_s11 = smul.f32 %s594_s7, %s743_s19 }
 0x105   :  { %s416_s12 = smul.f32 %s594_s7, %s745_s20  ;;  %484 = sst [smem:[#allocation7 + $0x1]] %s412_s10 }
 0x106   :  { %s418_s13 = smul.f32 %s594_s7, %s747_s21  ;;  %s428_s14 = sadd.f32 %s414_s11, %s412_s10 }
 0x107   :  { %s420_s15 = smul.f32 %s594_s7, %s749_s22  ;;  %486 = sst [smem:[#allocation7 + $0x2]] %s414_s11 }
 0x108   :  { %s596_s0 = spop %595  ;;  %s426_s24 = smul.f32 %s594_s7, %s782_s1 }
 0x109   :  { %s423_s23 = smul.f32 %s596_s0, %s422_s6  ;;  %s429_s27 = sadd.f32 %s428_s14, %s416_s12 }
 0x10a   :  { %488 = sst [smem:[#allocation7 + $0x3]] %s416_s12  ;;  %s427_s19 = smul.f32 0.25, %s426_s24 }
 0x10b   :  { %s424_s25 = sadd.f32 %s423_s23, %s420_s15  ;;  %s439_s21 = smul.f32 %s596_s0, %s757_s26 }
 0x10c   :  { %s430_s18 = sadd.f32 %s429_s27, %s418_s13  ;;  %s518_s1 = sshll.u32 %s783_s2, 4  ;;  %s519_s1 = int_to_ptr.hbm [resolvable:$true] %s518_s1 }
 0x10d   :  { %490 = sst [smem:[#allocation7 + $0x4]] %s418_s13  ;;  %s668_s9 = smov [#allocation7]  }
 0x10e   :  { %s431_s20 = sadd.f32 %s430_s18, %s424_s25 }
 0x10f   :  { %492 = sst [smem:[#allocation7 + $0x5]] %s424_s25 }
 0x110   :  { %s432_s22 = sadd.f32 %s431_s20, %s427_s19 }
 0x111   :  { %494 = sst [smem:[#allocation7 + $0x6]] %s427_s19 }
 0x112   :  { %482 = sst [smem:[#allocation7]] %s432_s22 }
 0x113   :  { %506 = sst [smem:[#allocation7 + $0xc]] %s439_s21 }
 0x121   :  { %s598_s30 = spop %597 }
 0x122   :  { %s477_s5 = smul.f32 %s598_s30, %s759_s3  ;;  %s600_s6 = spop %599 }
 0x123   :  { %s478_s7 = smul.f32 %s600_s6, %s759_s3 }
 0x124   :  { %502 = sst [smem:[#allocation7 + $0xa]] %s477_s5  ;;  %s480_s8 = smul.f32 %s600_s6, %s761_s4 }
 0x125   :  { %498 = sst [smem:[#allocation7 + $0x8]] %s478_s7 }
 0x126   :  { %500 = sst [smem:[#allocation7 + $0x9]] %s480_s8 }
 0x127   :  { %521 = dma.smem_to_hbm %s668_s9, 16, %s519_s1, [#allocation6]  }
 0x128   :  { %661 = dma.done.wait [#allocation6], 16  }
 0x129   :  { %662 = vsyncadd [#allocation6], 4294967280 }
 0x12a   :  { %526 = sfence }
 0x12b   :  { %527 = vsyncpa [#allocation5], 1 }
 0x12c   :  { %528 = vsyncpa [#allocation6], 1 }

</bundles_post_ra>
